<compile_context>
chip_gen: v5e
topology: v5e:2x2
jax: 0.10.0
libtpu: 0.0.40
codegen_flags: <defaults>
</compile_context>

<pallas_src>
import jax
import jax.numpy as jnp
from jax.experimental import pallas as pl
from jax.experimental.pallas import tpu as pltpu


def _round_up(x, m):
    return ((x + m - 1) // m) * m


def _pick_tm(M, tm_want):
    """Row-tile: full M for small M, else prefer a divisor of M (no x pad)."""
    if M <= tm_want:
        return M
    for step in (16, 8):  # multiples of 16 preferred for bf16 sublane packing
        start = tm_want - (tm_want % step)
        for cand in range(start, step - 1, -step):
            if cand and M % cand == 0:
                return cand
    # TODO(synk): handle the ragged M tail in-kernel (masked store) instead of
    # padding x in the wrapper.
    return tm_want


def _pick_tk(K, tm, tn, in_bytes, budget_bytes=12 << 20):
    """K-tile: whole K when the double-buffered input blocks fit the budget
    (keeps 'weight read once'); else the largest 128-multiple dividing K."""
    def blocks_bytes(tk):
        return 2 * (tm + tn) * tk * in_bytes  # double-buffered x + w blocks
    if K <= 512 or blocks_bytes(K) <= budget_bytes:
        return K
    best = None
    for cand in range(128, K, 128):
        if K % cand == 0 and blocks_bytes(cand) <= budget_bytes:
            best = cand
    if best is not None:
        return best
    # TODO(synk): ragged-K tail handling; fall back to whole K.
    return K


def _linear_relu_kernel(x_ref, w_ref, b_ref, o_ref, acc_ref):
    """One (tm, tn) output tile.  grid = (n_tiles, m_tiles, k_tiles).

    x_ref:   (tm, tk) activations (compute dtype, e.g. bf16)
    w_ref:   (tk, tn) pre-transposed weight slab (compute dtype)
    b_ref:   (1,  tn) bias, f32
    o_ref:   (tm, tn) output
    acc_ref: (tm, tn) f32 accumulator, resident across the K axis
    """
    k = pl.program_id(2)

    @pl.when(k == 0)
    def _():
        acc_ref[...] = jnp.zeros_like(acc_ref)

    acc_ref[...] += jnp.dot(
        x_ref[...], w_ref[...], preferred_element_type=jnp.float32)

    @pl.when(k == pl.num_programs(2) - 1)
    def _():
        y = acc_ref[...] + b_ref[...]                          # f32 bias add
        o_ref[...] = jnp.maximum(y, 0.0).astype(o_ref.dtype)   # f32 ReLU, cast


def prepare_linear_params(weight, bias, *, tn=256, compute_dtype=jnp.bfloat16):
    """One-time, LOAD-TIME parameter prep (keep out of the per-step hot path).

    weight: (N, K) PyTorch layout; bias: (N,).
    Returns (w_t, b2, n_valid, tn):
      w_t: (K, n_pad) in compute_dtype; N zero-padded to a lane-dense multiple
           of tn and pre-transposed so the kernel runs a plain (tm,tk)x(tk,tn)
           dot (no per-tile transpose on the MXU ingest path, incl. v5e).
      b2 : (1, n_pad) f32 bias.
    """
    N, K = weight.shape
    assert bias.shape == (N,)
    tn = int(min(tn, _round_up(N, 128)))
    n_pad = _round_up(N, tn)
    w, b = weight, bias
    if n_pad != N:
        w = jnp.pad(w, ((0, n_pad - N), (0, 0)))  # zero rows -> sliced off later
        b = jnp.pad(b, (0, n_pad - N))
    w_t = jnp.asarray(w.T, dtype=compute_dtype)   # (K, n_pad)
    b2 = jnp.asarray(b, dtype=jnp.float32).reshape(1, n_pad)
    return w_t, b2, N, tn


def linear_relu_prepared(x, w_t, b2, *, n_valid, tn, tm=512):
    """y = relu(x @ W.T + b) using prepared (padded/transposed/cast) params."""
    M, K = x.shape
    K_w, n_pad = w_t.shape
    assert K == K_w and n_pad % tn == 0 and b2.shape == (1, n_pad)

    in_bytes = jnp.dtype(w_t.dtype).itemsize
    out_dtype = x.dtype
    out_bytes = jnp.dtype(out_dtype).itemsize

    # Cast activations to the compute dtype (bf16 by default).
    x_in = x.astype(w_t.dtype) if x.dtype != w_t.dtype else x

    # ---- tiling ----
    tm = _pick_tm(M, tm)
    m_pad = _round_up(M, tm)
    if m_pad != M:
        x_in = jnp.pad(x_in, ((0, m_pad - M), (0, 0)))
    tk = _pick_tk(K, tm, tn, in_bytes)

    grid = (n_pad // tn, m_pad // tm, pl.cdiv(K, tk))  # N outer, M, K innermost

    # ---- explicit VMEM budget with headroom (fits v7x's 64 MiB physical) ----
    vmem_est = (2 * (tm + tn) * tk * in_bytes   # double-buffered x, w blocks
                + 2 * tn * 4                    # bias block
                + 2 * tm * tn * out_bytes       # double-buffered out block
                + tm * tn * 4)                  # f32 accumulator scratch
    vmem_limit = int(min(2 * vmem_est + (16 << 20), 48 << 20))

    cost = pl.CostEstimate(
        flops=2 * m_pad * n_pad * K,
        bytes_accessed=(m_pad * K + K * n_pad) * in_bytes
        + m_pad * n_pad * out_bytes + n_pad * 4,
        transcendentals=0,
    )

    out = pl.pallas_call(
        _linear_relu_kernel,
        out_shape=jax.ShapeDtypeStruct((m_pad, n_pad), out_dtype),
        grid_spec=pltpu.PrefetchScalarGridSpec(
            num_scalar_prefetch=0,
            grid=grid,
            in_specs=[
                pl.BlockSpec((tm, tk), lambda n, m, k: (m, k)),  # x rows
                pl.BlockSpec((tk, tn), lambda n, m, k: (k, n)),  # (K,N) weight slab
                pl.BlockSpec((1, tn), lambda n, m, k: (0, n)),   # bias slab
            ],
            out_specs=pl.BlockSpec((tm, tn), lambda n, m, k: (m, n)),
            scratch_shapes=[pltpu.VMEM((tm, tn), jnp.float32)],
        ),
        compiler_params=pltpu.CompilerParams(
            dimension_semantics=("parallel", "parallel", "arbitrary"),
            vmem_limit_bytes=vmem_limit,
        ),
        cost_estimate=cost,
    )(x_in, w_t, b2)

    # Strip tiling / lane-density padding only if any was added.
    if m_pad != M:
        out = out[:M]
    if n_pad != n_valid:
        out = out[:, :n_valid]
    return out


def linear_relu(x, weight, bias, *, compute_dtype=jnp.bfloat16, tm=512, tn=256):
    """Convenience wrapper matching SampleModule.forward (relu(linear(x))).

    Prefer prepare_linear_params() + linear_relu_prepared() in real use so the
    weight padding/transpose/cast happens once at load time, not per call.
    """
    w_t, b2, n_valid, tn = prepare_linear_params(
        weight, bias, tn=tn, compute_dtype=compute_dtype)
    return linear_relu_prepared(x, w_t, b2, n_valid=n_valid, tn=tn, tm=tm)


if __name__ == "__main__":
    key = jax.random.PRNGKey(0)
    kx, kw, kb = jax.random.split(key, 3)

    batch = 8
    in_features = 32
    out_features = 64

    x = jax.random.normal(kx, (batch, in_features), dtype=jnp.float32)
    # Deterministic synthetic Linear params (PyTorch-shaped: (out, in), (out,))
    bound = 1.0 / (in_features ** 0.5)
    weight = jax.random.uniform(kw, (out_features, in_features),
                                minval=-bound, maxval=bound, dtype=jnp.float32)
    bias = jax.random.uniform(kb, (out_features,),
                              minval=-bound, maxval=bound, dtype=jnp.float32)

    ref = jnp.maximum(x @ weight.T + bias, 0.0)

    # Recommended bf16 compute path (f32 accumulate + f32 epilogue).
    w_t, b2, n_valid, tn = prepare_linear_params(
        weight, bias, compute_dtype=jnp.bfloat16)
    out_bf16 = jax.block_until_ready(
        linear_relu_prepared(x, w_t, b2, n_valid=n_valid, tn=tn))
    assert out_bf16.shape == (batch, out_features)
    assert jnp.allclose(out_bf16, ref, atol=5e-2, rtol=5e-2)

    # f32 compute path, tight tolerance.
    w_t32, b32, n32, tn32 = prepare_linear_params(
        weight, bias, compute_dtype=jnp.float32)
    out_f32 = jax.block_until_ready(
        linear_relu_prepared(x, w_t32, b32, n_valid=n32, tn=tn32))
    assert jnp.allclose(out_f32, ref, atol=1e-5, rtol=1e-5)

    print("KERNEL_OK")
</pallas_src>

<mosaic_0001>
module attributes {stable_mosaic.version = 11 : i64} {
  func.func @_linear_relu_kernel(%arg0: i32, %arg1: i32, %arg2: i32, %arg3: memref<8x32xbf16, #tpu.memory_space<vmem>>, %arg4: memref<32x128xbf16, #tpu.memory_space<vmem>>, %arg5: memref<1x128xf32, #tpu.memory_space<vmem>>, %arg6: memref<8x128xf32, #tpu.memory_space<vmem>>, %arg7: memref<8x128xf32, #tpu.memory_space<vmem>>) attributes {dimension_semantics = [#tpu.dimension_semantics<parallel>, #tpu.dimension_semantics<parallel>, #tpu.dimension_semantics<arbitrary>], iteration_bounds = array<i64: 1, 1, 1>, scalar_prefetch = 0 : i64, scratch_operands = 1 : i64, tpu.core_type = #tpu.core_type<tc>, window_params = [{transform_indices = @transform_0, window_bounds = array<i64: 8, 32>}, {transform_indices = @transform_1, window_bounds = array<i64: 32, 128>}, {transform_indices = @transform_2, window_bounds = array<i64: 1, 128>}, {transform_indices = @transform_3, window_bounds = array<i64: 8, 128>}]} {
    %c0_i32 = arith.constant 0 : i32
    %0 = arith.cmpi eq, %arg2, %c0_i32 : i32
    %1 = arith.extui %0 : i1 to i32
    %c0_i32_0 = arith.constant 0 : i32
    %2 = arith.cmpi ne, %1, %c0_i32_0 : i32
    scf.if %2 {
      %cst_10 = arith.constant 0.000000e+00 : f32
      %12 = vector.broadcast %cst_10 : f32 to vector<8x128xf32>
      %c0_11 = arith.constant 0 : index
      %c0_12 = arith.constant 0 : index
      %13 = vector.load %arg7[%c0_11, %c0_12] : memref<8x128xf32, #tpu.memory_space<vmem>>, vector<8x128xf32>
      tpu.vector_store %arg7[%c0_11, %c0_12], %12 {strides = array<i32>} : memref<8x128xf32, #tpu.memory_space<vmem>>, vector<8x128xf32>,
    } else {
    }
    %c0 = arith.constant 0 : index
    %c0_1 = arith.constant 0 : index
    %3 = vector.load %arg7[%c0, %c0_1] : memref<8x128xf32, #tpu.memory_space<vmem>>, vector<8x128xf32>
    %c0_2 = arith.constant 0 : index
    %c0_3 = arith.constant 0 : index
    %4 = vector.load %arg3[%c0_2, %c0_3] : memref<8x32xbf16, #tpu.memory_space<vmem>>, vector<8x32xbf16>
    %c0_4 = arith.constant 0 : index
    %c0_5 = arith.constant 0 : index
    %5 = vector.load %arg4[%c0_4, %c0_5] : memref<32x128xbf16, #tpu.memory_space<vmem>>, vector<32x128xbf16>
    %cst = arith.constant dense<0.000000e+00> : vector<8x128xf32>
    %6 = tpu.matmul %4, %5, %cst {dimension_numbers = #tpu.dot_dimension_numbers<[1], [0], [0], [1], [0, 0, 1, 1], [], []>} : vector<8x32xbf16>, vector<32x128xbf16>, vector<8x128xf32> -> vector<8x128xf32>
    %7 = arith.addf %3, %6 : vector<8x128xf32>
    %c0_6 = arith.constant 0 : index
    %c0_7 = arith.constant 0 : index
    %8 = vector.load %arg7[%c0_6, %c0_7] : memref<8x128xf32, #tpu.memory_space<vmem>>, vector<8x128xf32>
    tpu.vector_store %arg7[%c0_6, %c0_7], %7 {strides = array<i32>} : memref<8x128xf32, #tpu.memory_space<vmem>>, vector<8x128xf32>,
    %c0_i32_8 = arith.constant 0 : i32
    %9 = arith.cmpi eq, %arg2, %c0_i32_8 : i32
    %10 = arith.extui %9 : i1 to i32
    %c0_i32_9 = arith.constant 0 : i32
    %11 = arith.cmpi ne, %10, %c0_i32_9 : i32
    scf.if %11 {
      %c0_10 = arith.constant 0 : index
      %c0_11 = arith.constant 0 : index
      %12 = vector.load %arg7[%c0_10, %c0_11] : memref<8x128xf32, #tpu.memory_space<vmem>>, vector<8x128xf32>
      %c0_12 = arith.constant 0 : index
      %c0_13 = arith.constant 0 : index
      %13 = vector.load %arg5[%c0_12, %c0_13] : memref<1x128xf32, #tpu.memory_space<vmem>>, vector<1x128xf32>
      %14 = vector.broadcast %13 : vector<1x128xf32> to vector<8x128xf32>
      %15 = arith.addf %12, %14 : vector<8x128xf32>
      %cst_14 = arith.constant 0.000000e+00 : f32
      %16 = vector.broadcast %cst_14 : f32 to vector<8x128xf32>
      %17 = arith.maximumf %15, %16 : vector<8x128xf32>
      %c0_15 = arith.constant 0 : index
      %c0_16 = arith.constant 0 : index
      %18 = vector.load %arg6[%c0_15, %c0_16] : memref<8x128xf32, #tpu.memory_space<vmem>>, vector<8x128xf32>
      tpu.vector_store %arg6[%c0_15, %c0_16], %17 {strides = array<i32>} : memref<8x128xf32, #tpu.memory_space<vmem>>, vector<8x128xf32>,
    } else {
    }
    return
  }
  func.func @transform_0(%arg0: i32, %arg1: i32, %arg2: i32) -> (i32, i32) {
    %c0_i32 = arith.constant 0 : i32
    return %arg1, %arg2 : i32, i32
  }
  func.func @transform_1(%arg0: i32, %arg1: i32, %arg2: i32) -> (i32, i32) {
    %c0_i32 = arith.constant 0 : i32
    return %arg2, %arg0 : i32, i32
  }
  func.func @transform_2(%arg0: i32, %arg1: i32, %arg2: i32) -> (i32, i32) {
    %c0_i32 = arith.constant 0 : i32
    %c0_i32_0 = arith.constant 0 : i32
    return %c0_i32, %arg0 : i32, i32
  }
  func.func @transform_3(%arg0: i32, %arg1: i32, %arg2: i32) -> (i32, i32) {
    %c0_i32 = arith.constant 0 : i32
    return %arg1, %arg0 : i32, i32
  }
}

</mosaic_0001>

<bundles_post_ra>
// kernel: tpu_custom_call.1
= control target key start
LH: loop header
LB: loop body
LE: loop exit
PB: predicated region body
PF: predicated region fallthrough
CT: control target
= control target key end

     0   :  { %8 = vsyncpa [#allocation4], 0  ;;  %s249_s0 = inlined_call_operand.hbm [shape: bf16[8,32], index: 0, kind: input, shape index: {}]   ;;  %s250_s1 = inlined_call_operand.hbm [shape: bf16[32,128], index: 1, kind: input, shape index: {}]   ;;  %s251_s2 = inlined_call_operand.vmem [shape: f32[1,128], index: 2, kind: input, shape index: {}]   ;;  %s252_s3 = inlined_call_operand.hbm [shape: f32[8,128], index: 3, kind: output, shape index: {}]  }
   0x1   :  { %9 = vsyncpa [#allocation7], 0 }
   0x2   :  { %10 = vsyncpa [#allocation5], 0  ;;  %s16_s14 = sshll.u32 %s249_s0, 4  ;;  %s212_s15 = smov [#allocation3]   ;;  %s17_s14 = int_to_ptr.hbm [resolvable:$true] %s16_s14 }
   0x3   :  { %s18_s16 = sshll.u32 %s212_s15, 4  ;;  %s26_s19 = sshll.u32 %s250_s1, 4  ;;  %s19_s16 = int_to_ptr.vmem [resolvable:$true] %s18_s16  ;;  %s27_s19 = int_to_ptr.hbm [resolvable:$true] %s26_s19 }
   0x4   :  { %21 = dma.hbm_to_vmem [thread:$0]  %s17_s14, 64, %s19_s16, [#allocation4]  }
   0x5   :  { %s213_s20 = smov [#allocation6]   ;;  %s214_s22 = smov 64  }
   0x6   :  { %s28_s21 = sshll.u32 %s213_s20, 4  ;;  %s215_s23 = smov 4   ;;  %s29_s21 = int_to_ptr.vmem [resolvable:$true] %s28_s21 }
   0x7   :  { %34 = dma.hbm_to_vmem [thread:$0]  %s27_s19, 256, %s29_s21, [#allocation7], %s214_s22, %s214_s22, %s215_s23  }
   0x8   :  { %206 = dma.done.wait [#allocation4], 64  }
   0x9   :  { %207 = vsyncadd [#allocation4], 4294967232 }
   0xa   :  { %208 = dma.done.wait [#allocation7], 256  }
   0xb   :  { %209 = vsyncadd [#allocation7], 4294967040  ;;  %v127_v0 = vld [vmem:[#allocation6 + $0x8] sm:$0xff]  ;;  %v126_v1 = vld [vmem:[#allocation6] sm:$0xff]  ;;  %vm69_vm0 = vcmask 261120   ;;  %s216_s24 = smov [#allocation8]  }
   0xc   :  { %79 = vmatpush.bf16.msra.mxu0 %v127_v0  ;;  %v52_v2 = vld [vmem:[#allocation3] sm:$0xf]  ;;  %s104_s25 = sshll.u32 %s216_s24, 4  ;;  %s106_s28 = sshll.u32 %s252_s3, 4  ;;  %s105_s25 = int_to_ptr.vmem [resolvable:$true] %s104_s25  ;;  %s107_s28 = int_to_ptr.hbm [resolvable:$true] %s106_s28 }
   0xd   :  { %v133_v3 = vld [vmem:[%s251_s2] ss:$0 sm:$0xff] }
  0x10   :  { %80 = vmatpush.bf16.msra.mxu0 %v126_v1 }
  0x13   :  { %125 = vmatmul.msk.bf16.vlgmr.msra.gmra.mxu0 %vm69_vm0, %v52_v2 }
  0x90   :  { %v82_v4 = vpop.f32.mrf.mxu0 }
  0x91   :  { %v96_v5 = vadd.f32 %v133_v3, %v82_v4 }
  0x93   :  { %v97_v6 = vmax.f32 %v96_v5, 0.0 }
  0x95   :  { %98 = vst [vmem:[#allocation8] sm:$0xff] %v97_v6 }
  0x96   :  { %109 = dma.vmem_to_hbm [thread:$0]  %s105_s25, 128, %s107_s28, [#allocation5]  }
  0x98   :  { %v84_v7 = vpop.f32.mrf.mxu0 }
  0x99   :  { %210 = dma.done.wait [#allocation5], 128  }
  0x9a   :  { %211 = vsyncadd [#allocation5], 4294967168 }
  0x9b   :  { %114 = vsyncpa [#allocation4], 1 }
  0x9c   :  { %115 = vsyncpa [#allocation7], 1 }
  0x9d   :  { %116 = vsyncpa [#allocation5], 1 }

</bundles_post_ra>
